<compile_context>
chip_gen: v5e
topology: v5e:2x2
jax: 0.10.0
libtpu: 0.0.40
codegen_flags: <defaults>
</compile_context>

<pallas_src>
import functools

import jax
import jax.numpy as jnp
from jax.experimental import pallas as pl
from jax.experimental.pallas import tpu as pltpu

_BN_EPS = 1e-5
_VMEM_STEP_BUDGET = 20 << 20   # per-grid-step working-set target (v7x-safe)
_VMEM_LIMIT = 32 << 20         # scoped VMEM limit handed to Mosaic
_MAX_SINGLE_K = 4608           # largest lane-aligned K kept as one block (9*512)


def _round_up(x, m):
    return (x + m - 1) // m * m


# ----------------------------- Pallas kernels ------------------------------ #

def _gemm_bn_kernel_single(p_ref, w_ref, shift_ref, *rest, relu, has_res):
    """out = act(p @ w + shift [+ res]); whole K in one block, no scratch."""
    if has_res:
        res_ref, o_ref = rest
    else:
        (o_ref,) = rest
        res_ref = None
    y = jnp.dot(p_ref[...], w_ref[...], preferred_element_type=jnp.float32)
    y = y + shift_ref[...]
    if res_ref is not None:
        y = y + res_ref[...].astype(jnp.float32)
    if relu:
        y = jnp.maximum(y, 0.0)
    o_ref[...] = y.astype(o_ref.dtype)


def _gemm_bn_kernel_ktiled(p_ref, w_ref, shift_ref, *rest, relu, has_res):
    """Same computation with a gridded K axis and f32 VMEM accumulator."""
    if has_res:
        res_ref, o_ref, acc_ref = rest
    else:
        o_ref, acc_ref = rest
        res_ref = None
    k = pl.program_id(1)

    @pl.when(k == 0)
    def _():
        acc_ref[...] = jnp.zeros_like(acc_ref)

    acc_ref[...] += jnp.dot(p_ref[...], w_ref[...],
                            preferred_element_type=jnp.float32)

    @pl.when(k == pl.num_programs(1) - 1)
    def _():
        y = acc_ref[...] + shift_ref[...]
        if res_ref is not None:
            y = y + res_ref[...].astype(jnp.float32)
        if relu:
            y = jnp.maximum(y, 0.0)
        o_ref[...] = y.astype(o_ref.dtype)


# ----------------------------- tiling / wrapper ----------------------------- #

def _choose_tiles(M, K, c_pad):
    """Pick (tm, tk, m_pad, k_pad) from a conservative (v7x-safe) VMEM budget."""
    k_aligned = _round_up(K, 128)         # lane-aligned reduction width
    if k_aligned > _MAX_SINGLE_K:
        tk = 1152                         # 9*128 -> legal, divides k_pad below
        k_pad = _round_up(K, tk)
    else:
        tk = k_aligned
        k_pad = k_aligned

    def step_bytes(tm):
        return (2 * tm * tk * 2           # patches tile, bf16, double-buffered
                + 2 * tk * c_pad * 2      # weight tile, bf16, double-buffered
                + 2 * tm * c_pad * 2      # residual tile, bf16, double-buffered
                + 2 * tm * c_pad * 4      # output tile, f32, double-buffered
                + tm * c_pad * 4)         # f32 accumulator scratch

    tm = 1024
    while tm > 8 and step_bytes(tm) > _VMEM_STEP_BUDGET:
        tm //= 2

    m_pad = _round_up(M, 8)
    tm = min(tm, m_pad)
    # Keep >=2 row programs whenever possible so the "parallel" M axis can be
    # split across both TensorCores (v7x) and the pipeline has >1 step.
    if m_pad // tm < 2 and m_pad >= 16:
        tm = max(8, _round_up(-(-m_pad // 2), 8))
    m_pad = _round_up(M, tm)
    return tm, tk, m_pad, k_pad


def _fused_gemm_bn(patches, w_scaled, shift, *, relu, residual=None,
                   out_dtype=jnp.float32):
    """act(patches @ w_scaled + shift [+ residual]) as a tiled Pallas GEMM.

    Operands hit the MXU in bf16 with f32 accumulation; BN scale is already
    folded into `w_scaled`, only the per-channel shift enters the kernel. The
    output-channel axis is padded to a multiple of 128 for lane-dense stores.
    """
    M, K = patches.shape
    C = w_scaled.shape[1]
    c_pad = _round_up(C, 128)
    tm, tk, m_pad, k_pad = _choose_tiles(M, K, c_pad)

    p = patches.astype(jnp.bfloat16)
    if (m_pad, k_pad) != (M, K):
        p = jnp.pad(p, ((0, m_pad - M), (0, k_pad - K)))
    w_b = w_scaled.astype(jnp.bfloat16)
    if (k_pad, c_pad) != (K, C):
        w_b = jnp.pad(w_b, ((0, k_pad - K), (0, c_pad - C)))
    shift2 = jnp.pad(shift.astype(jnp.float32), (0, c_pad - C)).reshape(1, c_pad)

    has_res = residual is not None
    single_k = (k_pad == tk)

    if single_k:
        grid = (m_pad // tm,)
        in_specs = [
            pl.BlockSpec((tm, tk), lambda i: (i, 0)),
            pl.BlockSpec((tk, c_pad), lambda i: (0, 0)),
            pl.BlockSpec((1, c_pad), lambda i: (0, 0)),
        ]
        out_specs = pl.BlockSpec((tm, c_pad), lambda i: (i, 0))
        scratch = []
        kernel = functools.partial(_gemm_bn_kernel_single,
                                   relu=relu, has_res=has_res)
        semantics = ("parallel",)
    else:
        grid = (m_pad // tm, k_pad // tk)
        in_specs = [
            pl.BlockSpec((tm, tk), lambda i, k: (i, k)),
            pl.BlockSpec((tk, c_pad), lambda i, k: (k, 0)),
            pl.BlockSpec((1, c_pad), lambda i, k: (0, 0)),
        ]
        out_specs = pl.BlockSpec((tm, c_pad), lambda i, k: (i, 0))
        scratch = [pltpu.VMEM((tm, c_pad), jnp.float32)]
        kernel = functools.partial(_gemm_bn_kernel_ktiled,
                                   relu=relu, has_res=has_res)
        semantics = ("parallel", "arbitrary")

    args = [p, w_b, shift2]
    if has_res:
        r = residual.astype(jnp.bfloat16)
        if r.shape != (m_pad, c_pad):
            r = jnp.pad(r, ((0, m_pad - M), (0, c_pad - C)))
        in_specs.append(
            pl.BlockSpec((tm, c_pad), (lambda i: (i, 0)) if single_k
                         else (lambda i, k: (i, 0))))
        args.append(r)

    out = pl.pallas_call(
        kernel,
        out_shape=jax.ShapeDtypeStruct((m_pad, c_pad), out_dtype),
        grid=grid,
        in_specs=in_specs,
        out_specs=out_specs,
        scratch_shapes=scratch,
        compiler_params=pltpu.CompilerParams(
            dimension_semantics=semantics,
            vmem_limit_bytes=_VMEM_LIMIT),
    )(*args)
    return out[:M, :C]


# ------------------------------ JAX glue ----------------------------------- #

def _im2col(x, stride):
    # x: (N, H, W, C) NHWC -> patches (N*Hout*Wout, 9*C) for a 3x3 conv, pad=1.
    # TODO(synk): the patch tensor is still materialized in HBM (in bf16); full
    # elimination would gather the 9 shifted windows inside the kernel.
    N, H, W, C = x.shape
    Hout, Wout = H // stride, W // stride
    xp = jnp.pad(x, ((0, 0), (1, 1), (1, 1), (0, 0)))
    cols = [
        xp[:, kh:kh + stride * Hout:stride, kw:kw + stride * Wout:stride, :]
        for kh in range(3) for kw in range(3)
    ]
    return jnp.concatenate(cols, axis=-1).reshape(N * Hout * Wout, 9 * C)


def _fold_bn(bn):
    scale = bn["gamma"] / jnp.sqrt(bn["var"] + _BN_EPS)
    shift = bn["beta"] - bn["mean"] * scale
    return scale, shift


def basic_block_forward(x_nchw, params, stride):
    x = jnp.transpose(x_nchw, (0, 2, 3, 1)).astype(jnp.float32)   # NHWC
    N, H, W, Cin = x.shape
    planes = params["w1"].shape[-1]
    Hout, Wout = H // stride, W // stride
    xb = x.astype(jnp.bfloat16)   # bf16 activations halve patch/residual HBM bytes

    # conv1 (3x3, stride, pad=1) + bn1 + relu  -- fused Pallas GEMM
    s1, b1 = _fold_bn(params["bn1"])
    w1 = (params["w1"] * s1).reshape(9 * Cin, planes)   # BN scale folded into weight
    p1 = _im2col(xb, stride)
    y1 = _fused_gemm_bn(p1, w1, b1, relu=True, out_dtype=jnp.bfloat16)
    y1 = y1.reshape(N, Hout, Wout, planes)

    # shortcut branch
    if stride != 1 or Cin != planes:
        ss, bs = _fold_bn(params["bns"])
        ws = params["ws"] * ss                           # 1x1 conv weight, BN-folded
        xs = xb[:, ::stride, ::stride, :].reshape(N * Hout * Wout, Cin)
        sc = _fused_gemm_bn(xs, ws, bs, relu=False, out_dtype=jnp.bfloat16)
    else:
        sc = xb.reshape(N * H * W, Cin)

    # conv2 (3x3, stride=1, pad=1) + bn2 + residual add + relu -- fused kernel
    s2, b2 = _fold_bn(params["bn2"])
    w2 = (params["w2"] * s2).reshape(9 * planes, planes)
    p2 = _im2col(y1, 1)
    y2 = _fused_gemm_bn(p2, w2, b2, relu=True, residual=sc, out_dtype=jnp.float32)
    out = y2.reshape(N, Hout, Wout, planes)
    return jnp.transpose(out, (0, 3, 1, 2))              # back to NCHW


# ------------------------- reference & parameters --------------------------- #

def basic_block_reference(x_nchw, params, stride):
    x = jnp.transpose(x_nchw, (0, 2, 3, 1)).astype(jnp.float32)
    Cin = x.shape[-1]
    planes = params["w1"].shape[-1]

    def conv(inp, w, s, pad):
        return jax.lax.conv_general_dilated(
            inp, w, window_strides=(s, s), padding=pad,
            dimension_numbers=("NHWC", "HWIO", "NHWC"),
            precision=jax.lax.Precision.HIGHEST)

    def bn(inp, b):
        return (inp - b["mean"]) / jnp.sqrt(b["var"] + _BN_EPS) * b["gamma"] + b["beta"]

    out = jax.nn.relu(bn(conv(x, params["w1"], stride, [(1, 1), (1, 1)]), params["bn1"]))
    out = bn(conv(out, params["w2"], 1, [(1, 1), (1, 1)]), params["bn2"])
    if stride != 1 or Cin != planes:
        sc = bn(conv(x, params["ws"][None, None], stride, [(0, 0), (0, 0)]), params["bns"])
    else:
        sc = x
    return jnp.transpose(jax.nn.relu(out + sc), (0, 3, 1, 2))


def init_params(key, in_planes, planes, stride):
    keys = jax.random.split(key, 6)

    def bn_params(k):
        k1, k2, k3, k4 = jax.random.split(k, 4)
        return dict(
            gamma=1.0 + 0.1 * jax.random.normal(k1, (planes,), jnp.float32),
            beta=0.1 * jax.random.normal(k2, (planes,), jnp.float32),
            mean=0.1 * jax.random.normal(k3, (planes,), jnp.float32),
            var=jax.random.uniform(k4, (planes,), jnp.float32, minval=0.5, maxval=1.5),
        )

    p = {
        "w1": jax.random.normal(keys[0], (3, 3, in_planes, planes), jnp.float32)
              * (9 * in_planes) ** -0.5,
        "w2": jax.random.normal(keys[1], (3, 3, planes, planes), jnp.float32)
              * (9 * planes) ** -0.5,
        "bn1": bn_params(keys[2]),
        "bn2": bn_params(keys[3]),
    }
    if stride != 1 or in_planes != planes:
        p["ws"] = jax.random.normal(keys[4], (in_planes, planes), jnp.float32) * in_planes ** -0.5
        p["bns"] = bn_params(keys[5])
    return p


if __name__ == "__main__":
    key = jax.random.PRNGKey(0)
    kx, kp1, kp2 = jax.random.split(key, 3)
    x = jax.random.normal(kx, (2, 4, 16, 16), jnp.float32)  # NCHW, like PyTorch

    fwd = jax.jit(basic_block_forward, static_argnums=2)

    # Case 1: identity shortcut (stride=1, in_planes == planes)
    params1 = init_params(kp1, in_planes=4, planes=4, stride=1)
    out1 = jax.block_until_ready(fwd(x, params1, 1))
    ref1 = basic_block_reference(x, params1, 1)

    # Case 2: projection shortcut (stride=2, in_planes != planes)
    params2 = init_params(kp2, in_planes=4, planes=8, stride=2)
    out2 = jax.block_until_ready(fwd(x, params2, 2))
    ref2 = basic_block_reference(x, params2, 2)

    assert out1.shape == (2, 4, 16, 16) and out2.shape == (2, 8, 8, 8)
    # bf16 MXU operands (two stacked convs) -> slightly looser tolerance vs the
    # Precision.HIGHEST f32 reference.
    assert jnp.allclose(out1, ref1, atol=5e-2, rtol=5e-2)
    assert jnp.allclose(out2, ref2, atol=5e-2, rtol=5e-2)
    print("KERNEL_OK")
</pallas_src>

<mosaic_0001>
module attributes {stable_mosaic.version = 11 : i64} {
  func.func @_gemm_bn_kernel_single(%arg0: i32, %arg1: memref<256x128xbf16, #tpu.memory_space<vmem>>, %arg2: memref<128x128xbf16, #tpu.memory_space<vmem>>, %arg3: memref<1x128xf32, #tpu.memory_space<vmem>>, %arg4: memref<256x128xbf16, #tpu.memory_space<vmem>>) attributes {dimension_semantics = [#tpu.dimension_semantics<parallel>], iteration_bounds = array<i64: 2>, scalar_prefetch = 0 : i64, scratch_operands = 0 : i64, tpu.core_type = #tpu.core_type<tc>, window_params = [{transform_indices = @transform_0, window_bounds = array<i64: 256, 128>}, {pipeline_mode = #tpu.pipeline_mode<synchronous>, transform_indices = @transform_1, window_bounds = array<i64: 128, 128>}, {pipeline_mode = #tpu.pipeline_mode<synchronous>, transform_indices = @transform_2, window_bounds = array<i64: 1, 128>}, {transform_indices = @transform_3, window_bounds = array<i64: 256, 128>}]} {
    %c0 = arith.constant 0 : index
    %c0_0 = arith.constant 0 : index
    %0 = vector.load %arg1[%c0, %c0_0] : memref<256x128xbf16, #tpu.memory_space<vmem>>, vector<256x128xbf16>
    %c0_1 = arith.constant 0 : index
    %c0_2 = arith.constant 0 : index
    %1 = vector.load %arg2[%c0_1, %c0_2] : memref<128x128xbf16, #tpu.memory_space<vmem>>, vector<128x128xbf16>
    %cst = arith.constant dense<0.000000e+00> : vector<256x128xf32>
    %2 = tpu.matmul %0, %1, %cst {dimension_numbers = #tpu.dot_dimension_numbers<[1], [0], [0], [1], [0, 0, 1, 1], [], []>} : vector<256x128xbf16>, vector<128x128xbf16>, vector<256x128xf32> -> vector<256x128xf32>
    %c0_3 = arith.constant 0 : index
    %c0_4 = arith.constant 0 : index
    %3 = vector.load %arg3[%c0_3, %c0_4] : memref<1x128xf32, #tpu.memory_space<vmem>>, vector<1x128xf32>
    %4 = vector.broadcast %3 : vector<1x128xf32> to vector<256x128xf32>
    %5 = arith.addf %2, %4 : vector<256x128xf32>
    %cst_5 = arith.constant 0.000000e+00 : f32
    %6 = vector.broadcast %cst_5 : f32 to vector<256x128xf32>
    %7 = arith.maximumf %5, %6 : vector<256x128xf32>
    %8 = arith.truncf %7 : vector<256x128xf32> to vector<256x128xbf16>
    %c0_6 = arith.constant 0 : index
    %c0_7 = arith.constant 0 : index
    %9 = vector.load %arg4[%c0_6, %c0_7] : memref<256x128xbf16, #tpu.memory_space<vmem>>, vector<256x128xbf16>
    tpu.vector_store %arg4[%c0_6, %c0_7], %8 {strides = array<i32>} : memref<256x128xbf16, #tpu.memory_space<vmem>>, vector<256x128xbf16>,
    return
  }
  func.func @transform_0(%arg0: i32) -> (i32, i32) {
    %c0_i32 = arith.constant 0 : i32
    %c0_i32_0 = arith.constant 0 : i32
    return %arg0, %c0_i32 : i32, i32
  }
  func.func @transform_1(%arg0: i32) -> (i32, i32) {
    %c0_i32 = arith.constant 0 : i32
    %c0_i32_0 = arith.constant 0 : i32
    %c0_i32_1 = arith.constant 0 : i32
    return %c0_i32, %c0_i32_0 : i32, i32
  }
  func.func @transform_2(%arg0: i32) -> (i32, i32) {
    %c0_i32 = arith.constant 0 : i32
    %c0_i32_0 = arith.constant 0 : i32
    %c0_i32_1 = arith.constant 0 : i32
    return %c0_i32, %c0_i32_0 : i32, i32
  }
  func.func @transform_3(%arg0: i32) -> (i32, i32) {
    %c0_i32 = arith.constant 0 : i32
    %c0_i32_0 = arith.constant 0 : i32
    return %arg0, %c0_i32 : i32, i32
  }
}

module attributes {stable_mosaic.version = 11 : i64} {
  func.func @_gemm_bn_kernel_single(%arg0: i32, %arg1: memref<256x128xbf16, #tpu.memory_space<vmem>>, %arg2: memref<128x128xbf16, #tpu.memory_space<vmem>>, %arg3: memref<1x128xf32, #tpu.memory_space<vmem>>, %arg4: memref<256x128xbf16, #tpu.memory_space<vmem>>, %arg5: memref<256x128xf32, #tpu.memory_space<vmem>>) attributes {dimension_semantics = [#tpu.dimension_semantics<parallel>], iteration_bounds = array<i64: 2>, scalar_prefetch = 0 : i64, scratch_operands = 0 : i64, tpu.core_type = #tpu.core_type<tc>, window_params = [{transform_indices = @transform_0, window_bounds = array<i64: 256, 128>}, {pipeline_mode = #tpu.pipeline_mode<synchronous>, transform_indices = @transform_1, window_bounds = array<i64: 128, 128>}, {pipeline_mode = #tpu.pipeline_mode<synchronous>, transform_indices = @transform_2, window_bounds = array<i64: 1, 128>}, {transform_indices = @transform_3, window_bounds = array<i64: 256, 128>}, {transform_indices = @transform_4, window_bounds = array<i64: 256, 128>}]} {
    %c0 = arith.constant 0 : index
    %c0_0 = arith.constant 0 : index
    %0 = vector.load %arg1[%c0, %c0_0] : memref<256x128xbf16, #tpu.memory_space<vmem>>, vector<256x128xbf16>
    %c0_1 = arith.constant 0 : index
    %c0_2 = arith.constant 0 : index
    %1 = vector.load %arg2[%c0_1, %c0_2] : memref<128x128xbf16, #tpu.memory_space<vmem>>, vector<128x128xbf16>
    %cst = arith.constant dense<0.000000e+00> : vector<256x128xf32>
    %2 = tpu.matmul %0, %1, %cst {dimension_numbers = #tpu.dot_dimension_numbers<[1], [0], [0], [1], [0, 0, 1, 1], [], []>} : vector<256x128xbf16>, vector<128x128xbf16>, vector<256x128xf32> -> vector<256x128xf32>
    %c0_3 = arith.constant 0 : index
    %c0_4 = arith.constant 0 : index
    %3 = vector.load %arg3[%c0_3, %c0_4] : memref<1x128xf32, #tpu.memory_space<vmem>>, vector<1x128xf32>
    %4 = vector.broadcast %3 : vector<1x128xf32> to vector<256x128xf32>
    %5 = arith.addf %2, %4 : vector<256x128xf32>
    %c0_5 = arith.constant 0 : index
    %c0_6 = arith.constant 0 : index
    %6 = vector.load %arg4[%c0_5, %c0_6] : memref<256x128xbf16, #tpu.memory_space<vmem>>, vector<256x128xbf16>
    %7 = arith.extf %6 : vector<256x128xbf16> to vector<256x128xf32>
    %8 = arith.addf %5, %7 : vector<256x128xf32>
    %cst_7 = arith.constant 0.000000e+00 : f32
    %9 = vector.broadcast %cst_7 : f32 to vector<256x128xf32>
    %10 = arith.maximumf %8, %9 : vector<256x128xf32>
    %c0_8 = arith.constant 0 : index
    %c0_9 = arith.constant 0 : index
    %11 = vector.load %arg5[%c0_8, %c0_9] : memref<256x128xf32, #tpu.memory_space<vmem>>, vector<256x128xf32>
    tpu.vector_store %arg5[%c0_8, %c0_9], %10 {strides = array<i32>} : memref<256x128xf32, #tpu.memory_space<vmem>>, vector<256x128xf32>,
    return
  }
  func.func @transform_0(%arg0: i32) -> (i32, i32) {
    %c0_i32 = arith.constant 0 : i32
    %c0_i32_0 = arith.constant 0 : i32
    return %arg0, %c0_i32 : i32, i32
  }
  func.func @transform_1(%arg0: i32) -> (i32, i32) {
    %c0_i32 = arith.constant 0 : i32
    %c0_i32_0 = arith.constant 0 : i32
    %c0_i32_1 = arith.constant 0 : i32
    return %c0_i32, %c0_i32_0 : i32, i32
  }
  func.func @transform_2(%arg0: i32) -> (i32, i32) {
    %c0_i32 = arith.constant 0 : i32
    %c0_i32_0 = arith.constant 0 : i32
    %c0_i32_1 = arith.constant 0 : i32
    return %c0_i32, %c0_i32_0 : i32, i32
  }
  func.func @transform_3(%arg0: i32) -> (i32, i32) {
    %c0_i32 = arith.constant 0 : i32
    %c0_i32_0 = arith.constant 0 : i32
    return %arg0, %c0_i32 : i32, i32
  }
  func.func @transform_4(%arg0: i32) -> (i32, i32) {
    %c0_i32 = arith.constant 0 : i32
    %c0_i32_0 = arith.constant 0 : i32
    return %arg0, %c0_i32 : i32, i32
  }
}

</mosaic_0001>

<bundles_post_ra>
// kernel: basic_block_forward.2
= control target key start
LH: loop header
LB: loop body
LE: loop exit
PB: predicated region body
PF: predicated region fallthrough
CT: control target
= control target key end

     0   :  { %s898_s12 = smov 0   ;;  %s1019_s0 = inlined_call_operand.vmem [shape: bf16[512,128], index: 0, kind: input, shape index: {}]   ;;  %s1020_s1 = inlined_call_operand.vmem [shape: bf16[128,128], index: 1, kind: input, shape index: {}]   ;;  %s1021_s2 = inlined_call_operand.vmem [shape: f32[1,128], index: 2, kind: input, shape index: {}]   ;;  %s1022_s3 = inlined_call_operand.vmem [shape: bf16[512,128], index: 3, kind: output, shape index: {}]  }
   0x1 LB: > { %s611_s13 = sadd.s32 4294967295, %s876_s12   ;;  %p615_p0 = scmp.ge.s32.totalorder %s876_s12, 1  ;;  %s876_s12 = sphi %s898_s12, %s13_s12  }
   0x2   : > { %p138_p1 = scmp.lt.s32.totalorder %s876_s12, 3 }
   0x4   : > { %p139_p2 = pnand %p615_p0, %p138_p1 }
   0x5   : > { %s616_s22 = sshll.u32 (!%p139_p2), %s611_s13, 5 }
   0x6   : > { %142 = sbr.rel (%p139_p2) target bundleno = 240 (0xf0), region = 32  ;;  %p163_p3 = scmp.lt.s32.totalorder (!%p139_p2), %s616_s22, 63 }
   0xb   : > { %v741_v0 = vld [vmem:[%s1020_s1 + $0x38] sm:$0xff]  ;;  %v740_v1 = vld [vmem:[%s1020_s1 + $0x30] sm:$0xff]  ;;  %v739_v2 = vld [vmem:[%s1020_s1 + $0x28] sm:$0xff]  ;;  %s1024_s22 = smov (!%p163_p3, %s616_s22), 63 }
   0xc   : > { %370 = vmatpush.bf16.msra.mxu0 %v741_v0  ;;  %837 = vmatpush.bf16.msra.mxu1 %v741_v0  ;;  %v738_v3 = vld [vmem:[%s1020_s1 + $0x20] sm:$0xff]  ;;  %v737_v4 = vld [vmem:[%s1020_s1 + $0x18] sm:$0xff]  ;;  %v736_v5 = vld [vmem:[%s1020_s1 + $0x10] sm:$0xff]  ;;  %s617_s29 = sshll.u32 %s1024_s22, 2 }
   0xd   : > { %838 = vmatpush.bf16.msra.mxu2 %v741_v0  ;;  %839 = vmatpush.bf16.msra.mxu3 %v741_v0  ;;  %v735_v6 = vld [vmem:[%s1020_s1 + $0x8] sm:$0xff]  ;;  %v734_v7 = vld [vmem:[%s1020_s1] sm:$0xff]  ;;  %s938_s7 = scalar_lea.vmem %s1019_s0, %s617_s29  ;;  %s970_s13 = scalar_lea.vmem %s1022_s3, %s617_s29 }
   0xe   : > { %v718_v8 = vld [vmem:[%s938_s7] sm:$0xff]  ;;  %v719_v12 = vld [vmem:[%s938_s7 + $0x8] sm:$0xff]  ;;  %v720_v16 = vld [vmem:[%s938_s7 + $0x10] sm:$0xff] }
   0xf   : > { %v722_v9 = vld [vmem:[%s938_s7 + $0x20] sm:$0xff]  ;;  %v723_v13 = vld [vmem:[%s938_s7 + $0x28] sm:$0xff]  ;;  %v724_v17 = vld [vmem:[%s938_s7 + $0x30] sm:$0xff] }
  0x10   : > { %371 = vmatpush.bf16.msra.mxu0 %v740_v1  ;;  %840 = vmatpush.bf16.msra.mxu1 %v740_v1  ;;  %v726_v10 = vld [vmem:[%s938_s7 + $0x40] sm:$0xff]  ;;  %v727_v14 = vld [vmem:[%s938_s7 + $0x48] sm:$0xff]  ;;  %v728_v18 = vld [vmem:[%s938_s7 + $0x50] sm:$0xff] }
  0x11   : > { %841 = vmatpush.bf16.msra.mxu2 %v740_v1  ;;  %842 = vmatpush.bf16.msra.mxu3 %v740_v1  ;;  %v730_v11 = vld [vmem:[%s938_s7 + $0x60] sm:$0xff]  ;;  %v731_v15 = vld [vmem:[%s938_s7 + $0x68] sm:$0xff]  ;;  %v732_v19 = vld [vmem:[%s938_s7 + $0x70] sm:$0xff] }
  0x12   : > { %v721_v20 = vld [vmem:[%s938_s7 + $0x18] sm:$0xff]  ;;  %v959_v26 = vld [vmem:[%s1021_s2] ss:$0 sm:$0xff] }
  0x13   : > { %v725_v21 = vld [vmem:[%s938_s7 + $0x38] sm:$0xff] }
  0x14   : > { %372 = vmatpush.bf16.msra.mxu0 %v739_v2  ;;  %843 = vmatpush.bf16.msra.mxu1 %v739_v2  ;;  %v729_v22 = vld [vmem:[%s938_s7 + $0x58] sm:$0xff] }
  0x15   : > { %844 = vmatpush.bf16.msra.mxu2 %v739_v2  ;;  %845 = vmatpush.bf16.msra.mxu3 %v739_v2  ;;  %v733_v23 = vld [vmem:[%s938_s7 + $0x78] sm:$0xff] }
  0x18   : > { %373 = vmatpush.bf16.msra.mxu0 %v738_v3  ;;  %846 = vmatpush.bf16.msra.mxu1 %v738_v3 }
  0x19   : > { %847 = vmatpush.bf16.msra.mxu2 %v738_v3  ;;  %848 = vmatpush.bf16.msra.mxu3 %v738_v3 }
  0x1c   : > { %374 = vmatpush.bf16.msra.mxu0 %v737_v4  ;;  %849 = vmatpush.bf16.msra.mxu1 %v737_v4 }
  0x1d   : > { %850 = vmatpush.bf16.msra.mxu2 %v737_v4  ;;  %851 = vmatpush.bf16.msra.mxu3 %v737_v4 }
  0x20   : > { %375 = vmatpush.bf16.msra.mxu0 %v736_v5  ;;  %852 = vmatpush.bf16.msra.mxu1 %v736_v5 }
  0x21   : > { %853 = vmatpush.bf16.msra.mxu2 %v736_v5  ;;  %854 = vmatpush.bf16.msra.mxu3 %v736_v5 }
  0x24   : > { %376 = vmatpush.bf16.msra.mxu0 %v735_v6  ;;  %855 = vmatpush.bf16.msra.mxu1 %v735_v6 }
  0x25   : > { %856 = vmatpush.bf16.msra.mxu2 %v735_v6  ;;  %857 = vmatpush.bf16.msra.mxu3 %v735_v6 }
  0x28   : > { %377 = vmatpush.bf16.msra.mxu0 %v734_v7  ;;  %858 = vmatpush.bf16.msra.mxu1 %v734_v7 }
  0x29   : > { %859 = vmatpush.bf16.msra.mxu2 %v734_v7  ;;  %860 = vmatpush.bf16.msra.mxu3 %v734_v7 }
  0x2b   : > { %378 = vmatmul.bf16.vlgmr.msra.gmra.mxu0 %v718_v8  ;;  %398 = vmatmul.bf16.vlgmr.msra.gmra.mxu1 %v722_v9 }
  0x2c   : > { %418 = vmatmul.bf16.vlgmr.msra.gmra.mxu2 %v726_v10  ;;  %438 = vmatmul.bf16.vlgmr.msra.gmra.mxu3 %v730_v11 }
  0x3b   : > { %383 = vmatmul.bf16.gmra.mxu0 %v719_v12  ;;  %403 = vmatmul.bf16.gmra.mxu1 %v723_v13 }
  0x3c   : > { %423 = vmatmul.bf16.gmra.mxu2 %v727_v14  ;;  %443 = vmatmul.bf16.gmra.mxu3 %v731_v15 }
  0x4b   : > { %388 = vmatmul.bf16.gmra.mxu0 %v720_v16  ;;  %408 = vmatmul.bf16.gmra.mxu1 %v724_v17 }
  0x4c   : > { %428 = vmatmul.bf16.gmra.mxu2 %v728_v18  ;;  %448 = vmatmul.bf16.gmra.mxu3 %v732_v19 }
  0x5b   : > { %393 = vmatmul.bf16.gmra.mxu0 %v721_v20  ;;  %413 = vmatmul.bf16.gmra.mxu1 %v725_v21 }
  0x5c   : > { %433 = vmatmul.bf16.gmra.mxu2 %v729_v22  ;;  %453 = vmatmul.bf16.gmra.mxu3 %v733_v23 }
  0xa8   : > { %v379_v24 = vpop.f32.mrf.mxu0  ;;  %v399_v25 = vpop.f32.mrf.mxu1 }
  0xa9   : > { %v380_v27 = vadd.f32 %v959_v26, %v379_v24  ;;  %v400_v28 = vadd.f32 %v959_v26, %v399_v25 }
  0xab   : > { %v459_v35 = vmax.f32 %v380_v27, 0.0  ;;  %v467_v36 = vmax.f32 %v400_v28, 0.0 }
  0xaf   : > { %v419_v29 = vpop.f32.mrf.mxu2  ;;  %v439_v30 = vpop.f32.mrf.mxu3 }
  0xb0   : > { %v381_v31 = vpop.f32.mrf.mxu0  ;;  %v401_v32 = vpop.f32.mrf.mxu1  ;;  %v420_v41 = vadd.f32 %v959_v26, %v419_v29  ;;  %v440_v42 = vadd.f32 %v959_v26, %v439_v30 }
  0xb1   : > { %v382_v33 = vadd.f32 %v959_v26, %v381_v31  ;;  %v402_v34 = vadd.f32 %v959_v26, %v401_v32 }
  0xb2   : > { %v475_v49 = vmax.f32 %v420_v41, 0.0  ;;  %v483_v50 = vmax.f32 %v440_v42, 0.0 }
  0xb3   : > { %v460_v37 = vmax.f32 %v382_v33, 0.0  ;;  %v468_v38 = vmax.f32 %v402_v34, 0.0 }
  0xb5   : > { %v745_v39 = vpack.c.bf16 %v460_v37, %v459_v35  ;;  %v765_v40 = vpack.c.bf16 %v468_v38, %v467_v36 }
  0xb7   : > { %746 = vst [vmem:[%s970_s13] sm:$0xff] %v745_v39   ;;  %v421_v43 = vpop.f32.mrf.mxu2  ;;  %v441_v44 = vpop.f32.mrf.mxu3 }
  0xb8   : > { %825 = vst [vmem:[%s970_s13 + $0x20] sm:$0xff] %v765_v40   ;;  %v422_v45 = vadd.f32 %v959_v26, %v421_v43  ;;  %v442_v46 = vadd.f32 %v959_v26, %v441_v44  ;;  %v384_v47 = vpop.f32.mrf.mxu0  ;;  %v404_v48 = vpop.f32.mrf.mxu1 }
  0xb9   : > { %v385_v55 = vadd.f32 %v959_v26, %v384_v47  ;;  %v405_v56 = vadd.f32 %v959_v26, %v404_v48 }
  0xba   : > { %v476_v51 = vmax.f32 %v422_v45, 0.0  ;;  %v484_v52 = vmax.f32 %v442_v46, 0.0 }
  0xbb   : > { %v461_v63 = vmax.f32 %v385_v55, 0.0  ;;  %v469_v0 = vmax.f32 %v405_v56, 0.0 }
  0xbc   : > { %v785_v53 = vpack.c.bf16 %v476_v51, %v475_v49  ;;  %v805_v54 = vpack.c.bf16 %v484_v52, %v483_v50 }
  0xbe   : > { %829 = vst [vmem:[%s970_s13 + $0x40] sm:$0xff] %v785_v53  }
  0xbf   : > { %833 = vst [vmem:[%s970_s13 + $0x60] sm:$0xff] %v805_v54   ;;  %v424_v57 = vpop.f32.mrf.mxu2  ;;  %v444_v58 = vpop.f32.mrf.mxu3 }
  0xc0   : > { %v386_v59 = vpop.f32.mrf.mxu0  ;;  %v406_v60 = vpop.f32.mrf.mxu1  ;;  %v425_v5 = vadd.f32 %v959_v26, %v424_v57  ;;  %v445_v6 = vadd.f32 %v959_v26, %v444_v58 }
  0xc1   : > { %v387_v61 = vadd.f32 %v959_v26, %v386_v59  ;;  %v407_v62 = vadd.f32 %v959_v26, %v406_v60 }
  0xc2   : > { %v477_v13 = vmax.f32 %v425_v5, 0.0  ;;  %v485_v14 = vmax.f32 %v445_v6, 0.0 }
  0xc3   : > { %v462_v1 = vmax.f32 %v387_v61, 0.0  ;;  %v470_v2 = vmax.f32 %v407_v62, 0.0 }
  0xc5   : > { %v750_v3 = vpack.c.bf16 %v462_v1, %v461_v63  ;;  %v770_v4 = vpack.c.bf16 %v470_v2, %v469_v0 }
  0xc7   : > { %822 = vst [vmem:[%s970_s13 + $0x8] sm:$0xff] %v750_v3   ;;  %v426_v7 = vpop.f32.mrf.mxu2  ;;  %v446_v8 = vpop.f32.mrf.mxu3 }
  0xc8   : > { %826 = vst [vmem:[%s970_s13 + $0x28] sm:$0xff] %v770_v4   ;;  %v427_v9 = vadd.f32 %v959_v26, %v426_v7  ;;  %v447_v10 = vadd.f32 %v959_v26, %v446_v8  ;;  %v389_v11 = vpop.f32.mrf.mxu0  ;;  %v409_v12 = vpop.f32.mrf.mxu1 }
  0xc9   : > { %v390_v19 = vadd.f32 %v959_v26, %v389_v11  ;;  %v410_v20 = vadd.f32 %v959_v26, %v409_v12 }
  0xca   : > { %v478_v15 = vmax.f32 %v427_v9, 0.0  ;;  %v486_v16 = vmax.f32 %v447_v10, 0.0 }
  0xcb   : > { %v463_v28 = vmax.f32 %v390_v19, 0.0  ;;  %v471_v29 = vmax.f32 %v410_v20, 0.0 }
  0xcc   : > { %v790_v17 = vpack.c.bf16 %v478_v15, %v477_v13  ;;  %v810_v18 = vpack.c.bf16 %v486_v16, %v485_v14 }
  0xce   : > { %830 = vst [vmem:[%s970_s13 + $0x48] sm:$0xff] %v790_v17  }
  0xcf   : > { %834 = vst [vmem:[%s970_s13 + $0x68] sm:$0xff] %v810_v18   ;;  %v429_v21 = vpop.f32.mrf.mxu2  ;;  %v449_v22 = vpop.f32.mrf.mxu3 }
  0xd0   : > { %v391_v23 = vpop.f32.mrf.mxu0  ;;  %v411_v24 = vpop.f32.mrf.mxu1  ;;  %v430_v34 = vadd.f32 %v959_v26, %v429_v21  ;;  %v450_v35 = vadd.f32 %v959_v26, %v449_v22 }
  0xd1   : > { %v392_v25 = vadd.f32 %v959_v26, %v391_v23  ;;  %v412_v27 = vadd.f32 %v959_v26, %v411_v24 }
  0xd2   : > { %v479_v42 = vmax.f32 %v430_v34, 0.0  ;;  %v487_v43 = vmax.f32 %v450_v35, 0.0 }
  0xd3   : > { %v464_v30 = vmax.f32 %v392_v25, 0.0  ;;  %v472_v31 = vmax.f32 %v412_v27, 0.0 }
  0xd5   : > { %v755_v32 = vpack.c.bf16 %v464_v30, %v463_v28  ;;  %v775_v33 = vpack.c.bf16 %v472_v31, %v471_v29 }
  0xd7   : > { %823 = vst [vmem:[%s970_s13 + $0x10] sm:$0xff] %v755_v32   ;;  %v431_v36 = vpop.f32.mrf.mxu2  ;;  %v451_v37 = vpop.f32.mrf.mxu3 }
  0xd8   : > { %827 = vst [vmem:[%s970_s13 + $0x30] sm:$0xff] %v775_v33   ;;  %v432_v38 = vadd.f32 %v959_v26, %v431_v36  ;;  %v452_v39 = vadd.f32 %v959_v26, %v451_v37  ;;  %v394_v40 = vpop.f32.mrf.mxu0  ;;  %v414_v41 = vpop.f32.mrf.mxu1 }
  0xd9   : > { %v395_v48 = vadd.f32 %v959_v26, %v394_v40  ;;  %v415_v49 = vadd.f32 %v959_v26, %v414_v41 }
  0xda   : > { %v480_v44 = vmax.f32 %v432_v38, 0.0  ;;  %v488_v45 = vmax.f32 %v452_v39, 0.0 }
  0xdb   : > { %v465_v56 = vmax.f32 %v395_v48, 0.0  ;;  %v473_v57 = vmax.f32 %v415_v49, 0.0 }
  0xdc   : > { %v795_v46 = vpack.c.bf16 %v480_v44, %v479_v42  ;;  %v815_v47 = vpack.c.bf16 %v488_v45, %v487_v43 }
  0xde   : > { %831 = vst [vmem:[%s970_s13 + $0x50] sm:$0xff] %v795_v46  }
  0xdf   : > { %835 = vst [vmem:[%s970_s13 + $0x70] sm:$0xff] %v815_v47   ;;  %v434_v50 = vpop.f32.mrf.mxu2  ;;  %v454_v51 = vpop.f32.mrf.mxu3 }
  0xe0   : > { %v396_v52 = vpop.f32.mrf.mxu0  ;;  %v416_v53 = vpop.f32.mrf.mxu1  ;;  %v435_v62 = vadd.f32 %v959_v26, %v434_v50  ;;  %v455_v63 = vadd.f32 %v959_v26, %v454_v51 }
  0xe1   : > { %v397_v54 = vadd.f32 %v959_v26, %v396_v52  ;;  %v417_v55 = vadd.f32 %v959_v26, %v416_v53 }
  0xe2   : > { %v481_v4 = vmax.f32 %v435_v62, 0.0  ;;  %v489_v5 = vmax.f32 %v455_v63, 0.0 }
  0xe3   : > { %v466_v58 = vmax.f32 %v397_v54, 0.0  ;;  %v474_v59 = vmax.f32 %v417_v55, 0.0 }
  0xe5   : > { %v760_v60 = vpack.c.bf16 %v466_v58, %v465_v56  ;;  %v780_v61 = vpack.c.bf16 %v474_v59, %v473_v57 }
  0xe7   : > { %824 = vst [vmem:[%s970_s13 + $0x18] sm:$0xff] %v760_v60   ;;  %v436_v0 = vpop.f32.mrf.mxu2  ;;  %v456_v1 = vpop.f32.mrf.mxu3 }
  0xe8   : > { %828 = vst [vmem:[%s970_s13 + $0x38] sm:$0xff] %v780_v61   ;;  %v437_v2 = vadd.f32 %v959_v26, %v436_v0  ;;  %v457_v3 = vadd.f32 %v959_v26, %v456_v1 }
  0xea   : > { %v482_v6 = vmax.f32 %v437_v2, 0.0  ;;  %v490_v7 = vmax.f32 %v457_v3, 0.0 }
  0xec   : > { %v800_v8 = vpack.c.bf16 %v482_v6, %v481_v4  ;;  %v820_v9 = vpack.c.bf16 %v490_v7, %v489_v5 }
  0xee   : > { %832 = vst [vmem:[%s970_s13 + $0x58] sm:$0xff] %v800_v8  }
  0xef   : > { %836 = vst [vmem:[%s970_s13 + $0x78] sm:$0xff] %v820_v9  }
  0xf0 PF: > { %s13_s12 = sadd.s32 1, %s876_s12  }
  0xf1   : > { %p10_p4 = scmp.ge.s32.totalorder %s13_s12, 4  }
  0xf3   :  { %12 = sbr.rel (!%p10_p4) target bundleno = 1 (0x1), region = 62 }

// kernel: basic_block_forward.3
= control target key start
LH: loop header
LB: loop body
LE: loop exit
PB: predicated region body
PF: predicated region fallthrough
CT: control target
= control target key end

     0   :  { %s1014_s15 = smov 0   ;;  %s1173_s0 = inlined_call_operand.vmem [shape: bf16[512,128], index: 0, kind: input, shape index: {}]   ;;  %s1174_s1 = inlined_call_operand.vmem [shape: bf16[128,128], index: 1, kind: input, shape index: {}]   ;;  %s1175_s2 = inlined_call_operand.vmem [shape: f32[1,128], index: 2, kind: input, shape index: {}]   ;;  %s1176_s3 = inlined_call_operand.vmem [shape: bf16[512,128], index: 3, kind: input, shape index: {}]   ;;  %s1177_s4 = inlined_call_operand.vmem [shape: f32[512,128], index: 4, kind: output, shape index: {}]  }
   0x1 LB: > { %s736_s16 = sadd.s32 4294967295, %s987_s15   ;;  %p740_p0 = scmp.ge.s32.totalorder %s987_s15, 1  ;;  %s987_s15 = sphi %s1014_s15, %s14_s15  }
   0x2   : > { %p174_p1 = scmp.lt.s32.totalorder %s987_s15, 3 }
   0x4   : > { %p175_p2 = pnand %p740_p0, %p174_p1 }
   0x5   : > { %s741_s25 = sshll.u32 (!%p175_p2), %s736_s16, 5 }
   0x6   : > { %178 = sbr.rel (%p175_p2) target bundleno = 240 (0xf0), region = 36  ;;  %p206_p3 = scmp.lt.s32.totalorder (!%p175_p2), %s741_s25, 63 }
   0xb   : > { %v868_v0 = vld [vmem:[%s1174_s1 + $0x38] sm:$0xff]  ;;  %v867_v1 = vld [vmem:[%s1174_s1 + $0x30] sm:$0xff]  ;;  %v866_v2 = vld [vmem:[%s1174_s1 + $0x28] sm:$0xff]  ;;  %s1179_s25 = smov (!%p206_p3, %s741_s25), 63 }
   0xc   : > { %419 = vmatpush.bf16.msra.mxu0 %v868_v0  ;;  %948 = vmatpush.bf16.msra.mxu1 %v868_v0  ;;  %v865_v3 = vld [vmem:[%s1174_s1 + $0x20] sm:$0xff]  ;;  %v864_v4 = vld [vmem:[%s1174_s1 + $0x18] sm:$0xff]  ;;  %v863_v5 = vld [vmem:[%s1174_s1 + $0x10] sm:$0xff]  ;;  %s742_s6 = sshll.u32 %s1179_s25, 2  ;;  %s746_s18 = sshll.u32 %s1179_s25, 3 }
   0xd   : > { %949 = vmatpush.bf16.msra.mxu2 %v868_v0  ;;  %950 = vmatpush.bf16.msra.mxu3 %v868_v0  ;;  %v862_v6 = vld [vmem:[%s1174_s1 + $0x8] sm:$0xff]  ;;  %v861_v7 = vld [vmem:[%s1174_s1] sm:$0xff]  ;;  %s1054_s11 = scalar_lea.vmem %s1173_s0, %s742_s6  ;;  %s1077_s14 = scalar_lea.vmem %s1176_s3, %s742_s6 }
   0xe   : > { %v845_v8 = vld [vmem:[%s1054_s11] sm:$0xff]  ;;  %v846_v12 = vld [vmem:[%s1054_s11 + $0x8] sm:$0xff]  ;;  %v847_v16 = vld [vmem:[%s1054_s11 + $0x10] sm:$0xff]  ;;  %s1094_s21 = scalar_lea.vmem %s1177_s4, %s746_s18 }
   0xf   : > { %v849_v9 = vld [vmem:[%s1054_s11 + $0x20] sm:$0xff]  ;;  %v850_v13 = vld [vmem:[%s1054_s11 + $0x28] sm:$0xff]  ;;  %v851_v17 = vld [vmem:[%s1054_s11 + $0x30] sm:$0xff] }
  0x10   : > { %420 = vmatpush.bf16.msra.mxu0 %v867_v1  ;;  %951 = vmatpush.bf16.msra.mxu1 %v867_v1  ;;  %v853_v10 = vld [vmem:[%s1054_s11 + $0x40] sm:$0xff]  ;;  %v854_v14 = vld [vmem:[%s1054_s11 + $0x48] sm:$0xff]  ;;  %v855_v18 = vld [vmem:[%s1054_s11 + $0x50] sm:$0xff] }
  0x11   : > { %952 = vmatpush.bf16.msra.mxu2 %v867_v1  ;;  %953 = vmatpush.bf16.msra.mxu3 %v867_v1  ;;  %v857_v11 = vld [vmem:[%s1054_s11 + $0x60] sm:$0xff]  ;;  %v858_v15 = vld [vmem:[%s1054_s11 + $0x68] sm:$0xff]  ;;  %v859_v19 = vld [vmem:[%s1054_s11 + $0x70] sm:$0xff] }
  0x12   : > { %v848_v20 = vld [vmem:[%s1054_s11 + $0x18] sm:$0xff]  ;;  %v870_v24 = vld [vmem:[%s1077_s14] sm:$0xff]   ;;  %v933_v57 = vld [vmem:[%s1077_s14 + $0x8] sm:$0xff]  }
  0x13   : > { %v852_v21 = vld [vmem:[%s1054_s11 + $0x38] sm:$0xff]  ;;  %v936_v25 = vld [vmem:[%s1077_s14 + $0x20] sm:$0xff]   ;;  %v871_v27 = vunpack.c.l.bf16 %v870_v24  ;;  %v872_v43 = vunpack.c.h.bf16 %v870_v24  ;;  %v937_v58 = vld [vmem:[%s1077_s14 + $0x28] sm:$0xff]   ;;  %v875_v1 = vunpack.c.l.bf16 %v933_v57 }
  0x14   : > { %421 = vmatpush.bf16.msra.mxu0 %v866_v2  ;;  %954 = vmatpush.bf16.msra.mxu1 %v866_v2  ;;  %v856_v22 = vld [vmem:[%s1054_s11 + $0x58] sm:$0xff]  ;;  %v1084_v26 = vld [vmem:[%s1175_s2] ss:$0 sm:$0xff]  ;;  %v887_v28 = vunpack.c.l.bf16 %v936_v25  ;;  %v888_v44 = vunpack.c.h.bf16 %v936_v25  ;;  %v892_v24 = vunpack.c.h.bf16 %v937_v58 }
  0x15   : > { %955 = vmatpush.bf16.msra.mxu2 %v866_v2  ;;  %956 = vmatpush.bf16.msra.mxu3 %v866_v2  ;;  %v860_v23 = vld [vmem:[%s1054_s11 + $0x78] sm:$0xff]  ;;  %v940_v35 = vld [vmem:[%s1077_s14 + $0x40] sm:$0xff]   ;;  %v891_v2 = vunpack.c.l.bf16 %v937_v58  ;;  %v942_v58 = vld [vmem:[%s1077_s14 + $0x50] sm:$0xff]  }
  0x16   : > { %v944_v36 = vld [vmem:[%s1077_s14 + $0x60] sm:$0xff]   ;;  %v903_v39 = vunpack.c.l.bf16 %v940_v35  ;;  %v904_v61 = vunpack.c.h.bf16 %v940_v35 }
  0x17   : > { %v919_v40 = vunpack.c.l.bf16 %v944_v36  ;;  %v920_v62 = vunpack.c.h.bf16 %v944_v36 }
  0x18   : > { %422 = vmatpush.bf16.msra.mxu0 %v865_v3  ;;  %957 = vmatpush.bf16.msra.mxu1 %v865_v3 }
  0x19   : > { %958 = vmatpush.bf16.msra.mxu2 %v865_v3  ;;  %959 = vmatpush.bf16.msra.mxu3 %v865_v3 }
  0x1c   : > { %423 = vmatpush.bf16.msra.mxu0 %v864_v4  ;;  %960 = vmatpush.bf16.msra.mxu1 %v864_v4 }
  0x1d   : > { %961 = vmatpush.bf16.msra.mxu2 %v864_v4  ;;  %962 = vmatpush.bf16.msra.mxu3 %v864_v4 }
  0x20   : > { %424 = vmatpush.bf16.msra.mxu0 %v863_v5  ;;  %963 = vmatpush.bf16.msra.mxu1 %v863_v5 }
  0x21   : > { %964 = vmatpush.bf16.msra.mxu2 %v863_v5  ;;  %965 = vmatpush.bf16.msra.mxu3 %v863_v5 }
  0x24   : > { %425 = vmatpush.bf16.msra.mxu0 %v862_v6  ;;  %966 = vmatpush.bf16.msra.mxu1 %v862_v6 }
  0x25   : > { %967 = vmatpush.bf16.msra.mxu2 %v862_v6  ;;  %968 = vmatpush.bf16.msra.mxu3 %v862_v6 }
  0x28   : > { %426 = vmatpush.bf16.msra.mxu0 %v861_v7  ;;  %969 = vmatpush.bf16.msra.mxu1 %v861_v7 }
  0x29   : > { %970 = vmatpush.bf16.msra.mxu2 %v861_v7  ;;  %971 = vmatpush.bf16.msra.mxu3 %v861_v7 }
  0x2b   : > { %427 = vmatmul.bf16.vlgmr.msra.gmra.mxu0 %v845_v8  ;;  %447 = vmatmul.bf16.vlgmr.msra.gmra.mxu1 %v849_v9 }
  0x2c   : > { %467 = vmatmul.bf16.vlgmr.msra.gmra.mxu2 %v853_v10  ;;  %487 = vmatmul.bf16.vlgmr.msra.gmra.mxu3 %v857_v11 }
  0x3b   : > { %432 = vmatmul.bf16.gmra.mxu0 %v846_v12  ;;  %452 = vmatmul.bf16.gmra.mxu1 %v850_v13  ;;  %v941_v13 = vld [vmem:[%s1077_s14 + $0x48] sm:$0xff]  }
  0x3c   : > { %472 = vmatmul.bf16.gmra.mxu2 %v854_v14  ;;  %492 = vmatmul.bf16.gmra.mxu3 %v858_v15  ;;  %v945_v14 = vld [vmem:[%s1077_s14 + $0x68] sm:$0xff]  }
  0x4b   : > { %437 = vmatmul.bf16.gmra.mxu0 %v847_v16  ;;  %457 = vmatmul.bf16.gmra.mxu1 %v851_v17 }
  0x4c   : > { %477 = vmatmul.bf16.gmra.mxu2 %v855_v18  ;;  %497 = vmatmul.bf16.gmra.mxu3 %v859_v19  ;;  %v907_v19 = vunpack.c.l.bf16 %v941_v13 }
  0x5b   : > { %442 = vmatmul.bf16.gmra.mxu0 %v848_v20  ;;  %462 = vmatmul.bf16.gmra.mxu1 %v852_v21  ;;  %v923_v20 = vunpack.c.l.bf16 %v945_v14 }
  0x5c   : > { %482 = vmatmul.bf16.gmra.mxu2 %v856_v22  ;;  %502 = vmatmul.bf16.gmra.mxu3 %v860_v23  ;;  %v876_v23 = vunpack.c.h.bf16 %v933_v57 }
  0xa8   : > { %v428_v29 = vpop.f32.mrf.mxu0  ;;  %v448_v30 = vpop.f32.mrf.mxu1 }
  0xa9   : > { %v429_v31 = vadd.f32 %v1084_v26, %v428_v29  ;;  %v449_v32 = vadd.f32 %v1084_v26, %v448_v30 }
  0xab   : > { %v572_v33 = vadd.f32 %v871_v27, %v429_v31  ;;  %v580_v34 = vadd.f32 %v887_v28, %v449_v32 }
  0xad   : > { %v604_v37 = vmax.f32 %v572_v33, 0.0  ;;  %v612_v38 = vmax.f32 %v580_v34, 0.0 }
  0xaf   : > { %636 = vst [vmem:[%s1094_s21] sm:$0xff] %v604_v37  ;;  %v468_v41 = vpop.f32.mrf.mxu2  ;;  %v488_v42 = vpop.f32.mrf.mxu3 }
  0xb0   : > { %644 = vst [vmem:[%s1094_s21 + $0x40] sm:$0xff] %v612_v38  ;;  %v469_v45 = vadd.f32 %v1084_v26, %v468_v41  ;;  %v489_v46 = vadd.f32 %v1084_v26, %v488_v42  ;;  %v430_v47 = vpop.f32.mrf.mxu0  ;;  %v450_v48 = vpop.f32.mrf.mxu1  ;;  %v934_v38 = vld [vmem:[%s1077_s14 + $0x10] sm:$0xff]   ;;  %v908_v42 = vunpack.c.h.bf16 %v941_v13 }
  0xb1   : > { %v431_v49 = vadd.f32 %v1084_v26, %v430_v47  ;;  %v451_v50 = vadd.f32 %v1084_v26, %v450_v48 }
  0xb2   : > { %v588_v51 = vadd.f32 %v903_v39, %v469_v45  ;;  %v596_v52 = vadd.f32 %v919_v40, %v489_v46  ;;  %v938_v39 = vld [vmem:[%s1077_s14 + $0x30] sm:$0xff]   ;;  %v879_v46 = vunpack.c.l.bf16 %v934_v38 }
  0xb3   : > { %v573_v53 = vadd.f32 %v872_v43, %v431_v49  ;;  %v581_v54 = vadd.f32 %v888_v44, %v451_v50  ;;  %v924_v43 = vunpack.c.h.bf16 %v945_v14  ;;  %v895_v47 = vunpack.c.l.bf16 %v938_v39 }
  0xb4   : > { %v620_v55 = vmax.f32 %v588_v51, 0.0  ;;  %v628_v56 = vmax.f32 %v596_v52, 0.0 }
  0xb5   : > { %v605_v59 = vmax.f32 %v573_v53, 0.0  ;;  %v613_v60 = vmax.f32 %v581_v54, 0.0 }
  0xb6   : > { %652 = vst [vmem:[%s1094_s21 + $0x80] sm:$0xff] %v620_v55 }
  0xb7   : > { %660 = vst [vmem:[%s1094_s21 + $0xc0] sm:$0xff] %v628_v56  ;;  %v470_v63 = vpop.f32.mrf.mxu2  ;;  %v490_v0 = vpop.f32.mrf.mxu3 }
  0xb8   : > { %637 = vst [vmem:[%s1094_s21 + $0x8] sm:$0xff] %v605_v59  ;;  %v471_v3 = vadd.f32 %v1084_v26, %v470_v63  ;;  %v491_v4 = vadd.f32 %v1084_v26, %v490_v0  ;;  %v433_v5 = vpop.f32.mrf.mxu0  ;;  %v453_v6 = vpop.f32.mrf.mxu1  ;;  %v946_v59 = vld [vmem:[%s1077_s14 + $0x70] sm:$0xff]   ;;  %v911_v0 = vunpack.c.l.bf16 %v942_v58 }
  0xb9   : > { %645 = vst [vmem:[%s1094_s21 + $0x48] sm:$0xff] %v613_v60  ;;  %v434_v7 = vadd.f32 %v1084_v26, %v433_v5  ;;  %v454_v8 = vadd.f32 %v1084_v26, %v453_v6  ;;  %v896_v5 = vunpack.c.h.bf16 %v938_v39  ;;  %v943_v39 = vld [vmem:[%s1077_s14 + $0x58] sm:$0xff]  }
  0xba   : > { %v589_v9 = vadd.f32 %v904_v61, %v471_v3  ;;  %v597_v10 = vadd.f32 %v920_v62, %v491_v4  ;;  %v880_v4 = vunpack.c.h.bf16 %v934_v38 }
  0xbb   : > { %v574_v11 = vadd.f32 %v875_v1, %v434_v7  ;;  %v582_v12 = vadd.f32 %v891_v2, %v454_v8  ;;  %v927_v1 = vunpack.c.l.bf16 %v946_v59 }
  0xbc   : > { %v621_v15 = vmax.f32 %v589_v9, 0.0  ;;  %v629_v16 = vmax.f32 %v597_v10, 0.0 }
  0xbd   : > { %v606_v17 = vmax.f32 %v574_v11, 0.0  ;;  %v614_v18 = vmax.f32 %v582_v12, 0.0 }
  0xbe   : > { %653 = vst [vmem:[%s1094_s21 + $0x88] sm:$0xff] %v621_v15 }
  0xbf   : > { %661 = vst [vmem:[%s1094_s21 + $0xc8] sm:$0xff] %v629_v16  ;;  %v473_v21 = vpop.f32.mrf.mxu2  ;;  %v493_v22 = vpop.f32.mrf.mxu3 }
  0xc0   : > { %638 = vst [vmem:[%s1094_s21 + $0x10] sm:$0xff] %v606_v17  ;;  %v474_v25 = vadd.f32 %v1084_v26, %v473_v21  ;;  %v494_v27 = vadd.f32 %v1084_v26, %v493_v22  ;;  %v435_v28 = vpop.f32.mrf.mxu0  ;;  %v455_v29 = vpop.f32.mrf.mxu1  ;;  %v912_v22 = vunpack.c.h.bf16 %v942_v58 }
  0xc1   : > { %646 = vst [vmem:[%s1094_s21 + $0x50] sm:$0xff] %v614_v18  ;;  %v436_v30 = vadd.f32 %v1084_v26, %v435_v28  ;;  %v456_v31 = vadd.f32 %v1084_v26, %v455_v29  ;;  %v935_v18 = vld [vmem:[%s1077_s14 + $0x18] sm:$0xff]  }
  0xc2   : > { %v590_v32 = vadd.f32 %v907_v19, %v474_v25  ;;  %v598_v33 = vadd.f32 %v923_v20, %v494_v27  ;;  %v939_v19 = vld [vmem:[%s1077_s14 + $0x38] sm:$0xff]   ;;  %v883_v27 = vunpack.c.l.bf16 %v935_v18 }
  0xc3   : > { %v575_v34 = vadd.f32 %v876_v23, %v436_v30  ;;  %v583_v35 = vadd.f32 %v892_v24, %v456_v31  ;;  %v928_v23 = vunpack.c.h.bf16 %v946_v59  ;;  %v899_v28 = vunpack.c.l.bf16 %v939_v19 }
  0xc4   : > { %v622_v36 = vmax.f32 %v590_v32, 0.0  ;;  %v630_v37 = vmax.f32 %v598_v33, 0.0 }
  0xc5   : > { %v607_v40 = vmax.f32 %v575_v34, 0.0  ;;  %v615_v41 = vmax.f32 %v583_v35, 0.0 }
  0xc6   : > { %654 = vst [vmem:[%s1094_s21 + $0x90] sm:$0xff] %v622_v36 }
  0xc7   : > { %662 = vst [vmem:[%s1094_s21 + $0xd0] sm:$0xff] %v630_v37  ;;  %v475_v44 = vpop.f32.mrf.mxu2  ;;  %v495_v45 = vpop.f32.mrf.mxu3 }
  0xc8   : > { %639 = vst [vmem:[%s1094_s21 + $0x18] sm:$0xff] %v607_v40  ;;  %v476_v48 = vadd.f32 %v1084_v26, %v475_v44  ;;  %v496_v49 = vadd.f32 %v1084_v26, %v495_v45  ;;  %v438_v50 = vpop.f32.mrf.mxu0  ;;  %v458_v51 = vpop.f32.mrf.mxu1  ;;  %v947_v40 = vld [vmem:[%s1077_s14 + $0x78] sm:$0xff]   ;;  %v915_v45 = vunpack.c.l.bf16 %v943_v39 }
  0xc9   : > { %647 = vst [vmem:[%s1094_s21 + $0x58] sm:$0xff] %v615_v41  ;;  %v439_v52 = vadd.f32 %v1084_v26, %v438_v50  ;;  %v459_v53 = vadd.f32 %v1084_v26, %v458_v51  ;;  %v900_v50 = vunpack.c.h.bf16 %v939_v19 }
  0xca   : > { %v591_v54 = vadd.f32 %v908_v42, %v476_v48  ;;  %v599_v55 = vadd.f32 %v924_v43, %v496_v49  ;;  %v884_v49 = vunpack.c.h.bf16 %v935_v18 }
  0xcb   : > { %v576_v56 = vadd.f32 %v879_v46, %v439_v52  ;;  %v584_v57 = vadd.f32 %v895_v47, %v459_v53  ;;  %v931_v46 = vunpack.c.l.bf16 %v947_v40 }
  0xcc   : > { %v623_v60 = vmax.f32 %v591_v54, 0.0  ;;  %v631_v61 = vmax.f32 %v599_v55, 0.0 }
  0xcd   : > { %v608_v62 = vmax.f32 %v576_v56, 0.0  ;;  %v616_v63 = vmax.f32 %v584_v57, 0.0 }
  0xce   : > { %655 = vst [vmem:[%s1094_s21 + $0x98] sm:$0xff] %v623_v60 }
  0xcf   : > { %663 = vst [vmem:[%s1094_s21 + $0xd8] sm:$0xff] %v631_v61  ;;  %v478_v2 = vpop.f32.mrf.mxu2  ;;  %v498_v3 = vpop.f32.mrf.mxu3 }
  0xd0   : > { %640 = vst [vmem:[%s1094_s21 + $0x20] sm:$0xff] %v608_v62  ;;  %v479_v6 = vadd.f32 %v1084_v26, %v478_v2  ;;  %v499_v7 = vadd.f32 %v1084_v26, %v498_v3  ;;  %v440_v8 = vpop.f32.mrf.mxu0  ;;  %v460_v9 = vpop.f32.mrf.mxu1  ;;  %v932_v2 = vunpack.c.h.bf16 %v947_v40 }
  0xd1   : > { %648 = vst [vmem:[%s1094_s21 + $0x60] sm:$0xff] %v616_v63  ;;  %v441_v10 = vadd.f32 %v1084_v26, %v440_v8  ;;  %v461_v11 = vadd.f32 %v1084_v26, %v460_v9 }
  0xd2   : > { %v592_v12 = vadd.f32 %v911_v0, %v479_v6  ;;  %v600_v13 = vadd.f32 %v927_v1, %v499_v7  ;;  %v916_v1 = vunpack.c.h.bf16 %v943_v39 }
  0xd3   : > { %v577_v14 = vadd.f32 %v880_v4, %v441_v10  ;;  %v585_v15 = vadd.f32 %v896_v5, %v461_v11 }
  0xd4   : > { %v624_v16 = vmax.f32 %v592_v12, 0.0  ;;  %v632_v17 = vmax.f32 %v600_v13, 0.0 }
  0xd5   : > { %v609_v20 = vmax.f32 %v577_v14, 0.0  ;;  %v617_v21 = vmax.f32 %v585_v15, 0.0 }
  0xd6   : > { %656 = vst [vmem:[%s1094_s21 + $0xa0] sm:$0xff] %v624_v16 }
  0xd7   : > { %664 = vst [vmem:[%s1094_s21 + $0xe0] sm:$0xff] %v632_v17  ;;  %v480_v24 = vpop.f32.mrf.mxu2  ;;  %v500_v25 = vpop.f32.mrf.mxu3 }
  0xd8   : > { %641 = vst [vmem:[%s1094_s21 + $0x28] sm:$0xff] %v609_v20  ;;  %v481_v29 = vadd.f32 %v1084_v26, %v480_v24  ;;  %v501_v30 = vadd.f32 %v1084_v26, %v500_v25  ;;  %v443_v31 = vpop.f32.mrf.mxu0  ;;  %v463_v32 = vpop.f32.mrf.mxu1 }
  0xd9   : > { %649 = vst [vmem:[%s1094_s21 + $0x68] sm:$0xff] %v617_v21  ;;  %v444_v33 = vadd.f32 %v1084_v26, %v443_v31  ;;  %v464_v34 = vadd.f32 %v1084_v26, %v463_v32 }
  0xda   : > { %v593_v35 = vadd.f32 %v912_v22, %v481_v29  ;;  %v601_v36 = vadd.f32 %v928_v23, %v501_v30 }
  0xdb   : > { %v578_v37 = vadd.f32 %v883_v27, %v444_v33  ;;  %v586_v38 = vadd.f32 %v899_v28, %v464_v34 }
  0xdc   : > { %v625_v41 = vmax.f32 %v593_v35, 0.0  ;;  %v633_v42 = vmax.f32 %v601_v36, 0.0 }
  0xdd   : > { %v610_v43 = vmax.f32 %v578_v37, 0.0  ;;  %v618_v44 = vmax.f32 %v586_v38, 0.0 }
  0xde   : > { %657 = vst [vmem:[%s1094_s21 + $0xa8] sm:$0xff] %v625_v41 }
  0xdf   : > { %665 = vst [vmem:[%s1094_s21 + $0xe8] sm:$0xff] %v633_v42  ;;  %v483_v47 = vpop.f32.mrf.mxu2  ;;  %v503_v48 = vpop.f32.mrf.mxu3 }
  0xe0   : > { %642 = vst [vmem:[%s1094_s21 + $0x30] sm:$0xff] %v610_v43  ;;  %v484_v51 = vadd.f32 %v1084_v26, %v483_v47  ;;  %v504_v52 = vadd.f32 %v1084_v26, %v503_v48  ;;  %v445_v53 = vpop.f32.mrf.mxu0  ;;  %v465_v54 = vpop.f32.mrf.mxu1 }
  0xe1   : > { %650 = vst [vmem:[%s1094_s21 + $0x70] sm:$0xff] %v618_v44  ;;  %v446_v55 = vadd.f32 %v1084_v26, %v445_v53  ;;  %v466_v56 = vadd.f32 %v1084_v26, %v465_v54 }
  0xe2   : > { %v594_v57 = vadd.f32 %v915_v45, %v484_v51  ;;  %v602_v58 = vadd.f32 %v931_v46, %v504_v52 }
  0xe3   : > { %v579_v59 = vadd.f32 %v884_v49, %v446_v55  ;;  %v587_v60 = vadd.f32 %v900_v50, %v466_v56 }
  0xe4   : > { %v626_v61 = vmax.f32 %v594_v57, 0.0  ;;  %v634_v62 = vmax.f32 %v602_v58, 0.0 }
  0xe5   : > { %v611_v63 = vmax.f32 %v579_v59, 0.0  ;;  %v619_v0 = vmax.f32 %v587_v60, 0.0 }
  0xe6   : > { %658 = vst [vmem:[%s1094_s21 + $0xb0] sm:$0xff] %v626_v61 }
  0xe7   : > { %666 = vst [vmem:[%s1094_s21 + $0xf0] sm:$0xff] %v634_v62  ;;  %v485_v3 = vpop.f32.mrf.mxu2  ;;  %v505_v4 = vpop.f32.mrf.mxu3 }
  0xe8   : > { %643 = vst [vmem:[%s1094_s21 + $0x38] sm:$0xff] %v611_v63  ;;  %v486_v5 = vadd.f32 %v1084_v26, %v485_v3  ;;  %v506_v6 = vadd.f32 %v1084_v26, %v505_v4 }
  0xe9   : > { %651 = vst [vmem:[%s1094_s21 + $0x78] sm:$0xff] %v619_v0 }
  0xea   : > { %v595_v7 = vadd.f32 %v916_v1, %v486_v5  ;;  %v603_v8 = vadd.f32 %v932_v2, %v506_v6 }
  0xec   : > { %v627_v9 = vmax.f32 %v595_v7, 0.0  ;;  %v635_v10 = vmax.f32 %v603_v8, 0.0 }
  0xee   : > { %659 = vst [vmem:[%s1094_s21 + $0xb8] sm:$0xff] %v627_v9 }
  0xef   : > { %667 = vst [vmem:[%s1094_s21 + $0xf8] sm:$0xff] %v635_v10 }
  0xf0 PF: > { %s14_s15 = sadd.s32 1, %s987_s15  }
  0xf1   : > { %p11_p4 = scmp.ge.s32.totalorder %s14_s15, 4  }
  0xf3   :  { %13 = sbr.rel (!%p11_p4) target bundleno = 1 (0x1), region = 69 }

</bundles_post_ra>
